<compile_context>
chip_gen: v6e
topology: v6e:2x2x1
jax: 0.10.0
libtpu: 0.0.40
codegen_flags: <defaults>
</compile_context>

<pallas_src>
from typing import Any, NamedTuple

import jax
import jax.numpy as jnp
from jax.experimental import pallas as pl
from jax.experimental.pallas import tpu as pltpu


def _cdiv(a, b):
    return -(-a // b)


def _round_up(x, m):
    return _cdiv(x, m) * m


def _vmem_policy():
    """Generation-aware VMEM budget / tile caps."""
    cap = None
    try:
        cap = int(pltpu.get_tpu_info().vmem_capacity_bytes)
    except Exception:
        cap = None
    kind = ""
    try:
        kind = jax.devices()[0].device_kind.lower()
    except Exception:
        pass
    is_v7 = ("v7" in kind) or ("tpu7" in kind) or (cap is not None and cap <= 96 * 1024 * 1024)
    if is_v7:
        # 64 MiB physical per TensorCore: claim ~48 MiB, leave headroom for compiler scratch.
        return {"budget": 48 * 1024 * 1024, "tm_max": 256, "tn_max": 256, "multi_core": True}
    # v5e / v6e: 128 MiB physical, single TensorCore -> go for big tiles (better HBM roofline).
    return {"budget": 100 * 1024 * 1024, "tm_max": 512, "tn_max": 512, "multi_core": False}


def _estimate_vmem_bytes(tm, tn, tk, rank_p, bytes_per, k_tiled):
    """Double-buffered tile footprint + resident scratch."""
    a_bufs = 2 if k_tiled else 1              # A is Buffered(1) when its block never changes
    est = bytes_per * (2 * tm * tk            # x tile
                       + 2 * tk * tn          # W^T tile
                       + a_bufs * tk * rank_p  # A
                       + 2 * rank_p * tn)     # scaled-B tile
    est += 4 * 2 * tm * tn                    # output tile (counted at f32 width, conservative)
    est += 4 * 2 * tn                         # bias tile (f32)
    est += 4 * tm * rank_p                    # xa = x @ A scratch (f32)
    if k_tiled:
        est += 4 * tm * tn                    # f32 K accumulator scratch
    return est


class LoRALinearParams(NamedTuple):
    Wt: Any            # (Kp, Np)  compute dtype, W^T, zero-padded
    bias: Any          # (1, Np)   float32
    A: Any             # (Kp, rank_p) compute dtype
    Bs: Any            # (rank_p, Np) compute dtype, (alpha/rank) folded in
    in_f: int
    out_f: int
    Kp: int
    Np: int
    rank_p: int
    tn: int
    tk: int
    k_tiled: bool
    tm_max: int
    sub: int
    vmem_budget: int
    multi_core: bool
    compute_dtype: Any


def prepare_lora_linear(W, b, A, B, alpha, rank, *, compute_dtype=None):
    """One-time layout prep. Do this at load time, NOT on every forward."""
    out_f, in_f = W.shape
    assert A.shape == (in_f, rank) and B.shape == (rank, out_f)
    compute_dtype = jnp.dtype(compute_dtype) if compute_dtype is not None else jnp.dtype(W.dtype)
    bytes_per = compute_dtype.itemsize
    sub = 8 * max(1, 4 // bytes_per)          # sublane packing: f32 -> 8, bf16 -> 16, int8 -> 32

    policy = _vmem_policy()
    budget, tm_max, tn_max = policy["budget"], policy["tm_max"], policy["tn_max"]

    rank_p = _round_up(rank, 128)             # lane-dense LoRA intermediate
    Np = _round_up(out_f, 128)

    # tn: largest multiple of 128 that divides the 128-padded out width and is <= tn_max.
    tn = 128
    for d in range(Np // 128, 0, -1):
        if 128 * d <= tn_max and (Np // 128) % d == 0:
            tn = 128 * d
            break

    def fits(tm_c, tn_c, tk_c, kt):
        return _estimate_vmem_bytes(tm_c, tn_c, tk_c, rank_p, bytes_per, kt) <= budget

    # K (in_features) tiling only when full-K tiles would blow the VMEM budget (large in_f
    # on v7x); otherwise keep the simpler single-K-tile path.
    Kp0 = _round_up(in_f, 128)
    tk, k_tiled, gk = in_f, False, 1
    while not fits(tm_max, tn, tk, k_tiled) and tk > 512:
        gk += 1
        tk = _round_up(_cdiv(Kp0, gk), 128)
        k_tiled = True
    if not fits(tm_max, tn, tk, k_tiled) and tn > 128:
        tn = 128                              # 128 always divides the padded out width
    while not fits(tm_max, tn, tk, k_tiled) and tm_max > sub:
        tm_max = max(sub, _round_up(tm_max // 2, sub))

    Kp = _round_up(in_f, tk) if k_tiled else in_f

    # Pre-transpose / pad once; fold the LoRA scale into B (rank x out, never M x out).
    Wt = jnp.pad(jnp.asarray(W, compute_dtype).T, ((0, Kp - in_f), (0, Np - out_f)))
    bias = jnp.pad(jnp.asarray(b, jnp.float32).reshape(1, out_f), ((0, 0), (0, Np - out_f)))
    A_p = jnp.pad(jnp.asarray(A, compute_dtype), ((0, Kp - in_f), (0, rank_p - rank)))
    Bs = jnp.pad((jnp.asarray(B, jnp.float32) * (alpha / rank)).astype(compute_dtype),
                 ((0, rank_p - rank), (0, Np - out_f)))

    return LoRALinearParams(Wt=Wt, bias=bias, A=A_p, Bs=Bs,
                            in_f=in_f, out_f=out_f, Kp=Kp, Np=Np, rank_p=rank_p,
                            tn=tn, tk=tk, k_tiled=k_tiled, tm_max=tm_max, sub=sub,
                            vmem_budget=budget, multi_core=policy["multi_core"],
                            compute_dtype=compute_dtype)


def _make_lora_kernel(*, n_axis, k_axis, reuse_xa, k_tiled):
    """One (tm, tn) output tile of  x @ W^T + b + (x @ A) @ (scale*B)."""

    def kernel(x_ref, wt_ref, b_ref, a_ref, bsc_ref, o_ref, xa_ref, *acc_scratch):
        k = pl.program_id(k_axis)

        # --- LoRA first stage: xa = x @ A (f32 scratch, accumulated over K tiles). ---
        def xa_step():
            if k_tiled:
                @pl.when(k == 0)
                def _():
                    xa_ref[...] = jnp.zeros_like(xa_ref)
                xa_ref[...] += jnp.dot(x_ref[...], a_ref[...],
                                       preferred_element_type=jnp.float32)
            else:
                xa_ref[...] = jnp.dot(x_ref[...], a_ref[...],
                                      preferred_element_type=jnp.float32)

        if reuse_xa:
            # x @ A is independent of the N tile: compute it once per M tile (N index 0)
            # and reuse it for all N tiles.
            @pl.when(pl.program_id(n_axis) == 0)
            def _():
                xa_step()
        else:
            # N axis is the leading/parallel axis (single M tile): recompute the tiny
            # x @ A per N tile so each core is self-contained.
            xa_step()

        def epilogue(base):
            out = base + jnp.dot(xa_ref[...].astype(bsc_ref.dtype), bsc_ref[...],
                                 preferred_element_type=jnp.float32)
            out += b_ref[...].astype(jnp.float32)
            o_ref[...] = out.astype(o_ref.dtype)

        # Base linear: plain GEMM against pre-transposed W (f32 accumulate on MXU).
        base = jnp.dot(x_ref[...], wt_ref[...], preferred_element_type=jnp.float32)
        if k_tiled:
            acc_ref = acc_scratch[0]

            @pl.when(k == 0)
            def _():
                acc_ref[...] = jnp.zeros_like(acc_ref)
            acc_ref[...] += base

            @pl.when(k == pl.num_programs(k_axis) - 1)
            def _():
                epilogue(acc_ref[...])
        else:
            epilogue(base)

    return kernel


def lora_linear_apply(params, x):
    """y = x @ W^T + b + (alpha/rank) * (x @ A) @ B for x of shape (..., in_features)."""
    p = params
    lead = x.shape[:-1]
    assert x.shape[-1] == p.in_f, f"expected last dim {p.in_f}, got {x.shape[-1]}"
    M = 1
    for s in lead:
        M *= s
    out_dtype = x.dtype
    bytes_per = p.compute_dtype.itemsize

    # ---- per-call tile / grid choices (cheap scalar math; weights are already laid out) ----
    gn = p.Np // p.tn
    gk = p.Kp // p.tk
    gm_target = _cdiv(M, p.tm_max)
    if p.multi_core and gm_target == 1 and gn == 1 and M >= 2 * p.sub:
        gm_target = 2                                     # keep both v7x TensorCores busy
    tm = min(p.tm_max, _round_up(_cdiv(M, gm_target), p.sub))   # minimize M padding
    Mp = _round_up(M, tm)
    gm = Mp // tm

    x2d = jnp.asarray(x, p.compute_dtype).reshape(M, p.in_f)
    if Mp > M or p.Kp > p.in_f:
        x2d = jnp.pad(x2d, ((0, Mp - M), (0, p.Kp - p.in_f)))

    # Decode-like shapes (single M tile, several N tiles): make N the leading/parallel
    # axis and recompute the tiny x@A per N tile instead of idling the second core.
    n_parallel = (gm == 1 and gn > 1)

    def wrap(f):
        if n_parallel:
            return lambda j, i, k: f(i, j, k)
        return lambda i, j, k: f(i, j, k)

    x_map = wrap(lambda i, j, k: (i, k))
    wt_map = wrap(lambda i, j, k: (k, j))
    b_map = wrap(lambda i, j, k: (0, j))
    a_map = wrap(lambda i, j, k: (k, 0))
    bsc_map = wrap(lambda i, j, k: (0, j))
    out_map = wrap(lambda i, j, k: (i, j))

    grid = (gn, gm, gk) if n_parallel else (gm, gn, gk)
    n_axis = 0 if n_parallel else 1
    kernel = _make_lora_kernel(n_axis=n_axis, k_axis=2,
                               reuse_xa=not n_parallel, k_tiled=gk > 1)

    scratch_shapes = [pltpu.VMEM((tm, p.rank_p), jnp.float32)]        # xa kept in f32
    if gk > 1:
        scratch_shapes.append(pltpu.VMEM((tm, p.tn), jnp.float32))    # K accumulator

    vmem_est = _estimate_vmem_bytes(tm, p.tn, p.tk, p.rank_p, bytes_per, gk > 1)
    vmem_limit = int(min(p.vmem_budget, max(vmem_est * 5 // 4, 16 * 1024 * 1024)))
    compiler_params = pltpu.CompilerParams(
        # Leading axis is independent across tiles -> parallel (megacore on v7x);
        # remaining axes reuse the xa / K-accumulator scratch -> arbitrary.
        dimension_semantics=("parallel", "arbitrary", "arbitrary"),
        vmem_limit_bytes=vmem_limit,
    )

    flops = (2 * Mp * p.Np * p.Kp                                        # base GEMM
             + 2 * Mp * p.rank_p * p.Kp * (gn if n_parallel else 1)      # x @ A
             + 2 * Mp * p.rank_p * p.Np)                                 # (x@A) @ B
    bytes_accessed = ((x2d.size + p.Wt.size + p.A.size + p.Bs.size) * bytes_per
                      + p.bias.size * 4 + Mp * p.Np * jnp.dtype(out_dtype).itemsize)
    cost = pl.CostEstimate(flops=int(flops), transcendentals=0,
                           bytes_accessed=int(bytes_accessed))

    def build(a_pipeline_mode):
        a_kwargs = {} if a_pipeline_mode is None else {"pipeline_mode": a_pipeline_mode}
        return pl.pallas_call(
            kernel,
            out_shape=jax.ShapeDtypeStruct((Mp, p.Np), out_dtype),
            grid=grid,
            in_specs=[
                pl.BlockSpec((tm, p.tk), x_map),                      # x tile
                pl.BlockSpec((p.tk, p.tn), wt_map),                   # W^T tile
                pl.BlockSpec((1, p.tn), b_map),                       # bias tile (f32)
                pl.BlockSpec((p.tk, p.rank_p), a_map, **a_kwargs),    # A
                pl.BlockSpec((p.rank_p, p.tn), bsc_map),              # scale*B tile
            ],
            out_specs=pl.BlockSpec((tm, p.tn), out_map),
            scratch_shapes=scratch_shapes,
            compiler_params=compiler_params,
            cost_estimate=cost,
        )

    args = (x2d, p.Wt, p.bias, p.A, p.Bs)
    if gk == 1:
        # A's block index is constant -> a single buffer suffices (saves VMEM on v7x);
        # fall back to the default double-buffered spec if Buffered(1) is rejected.
        try:
            out2d = build(pl.Buffered(1))(*args)
        except Exception:
            out2d = build(None)(*args)
    else:
        out2d = build(None)(*args)

    return out2d[:M, :p.out_f].reshape(*lead, p.out_f)


def lora_decorator_forward(x, W, b, A, B, alpha, rank, *, compute_dtype=None):
    """One-shot convenience path. Prefer prepare_lora_linear() once + lora_linear_apply()."""
    return lora_linear_apply(
        prepare_lora_linear(W, b, A, B, alpha, rank, compute_dtype=compute_dtype), x)


if __name__ == "__main__":

    def make_inputs(key, batch, seq, in_f, out_f, rank):
        kx, kw, kb, ka, kB = jax.random.split(key, 5)
        x = jax.random.normal(kx, (batch, seq, in_f), dtype=jnp.float32)
        W = jax.random.normal(kw, (out_f, in_f), dtype=jnp.float32) * 0.1
        b = jax.random.normal(kb, (out_f,), dtype=jnp.float32) * 0.1
        A = jax.random.normal(ka, (in_f, rank), dtype=jnp.float32) * 0.1
        B = jax.random.normal(kB, (rank, out_f), dtype=jnp.float32) * 0.1
        return x, W, b, A, B

    def check(out, ref, atol, rtol, name):
        assert out.shape == ref.shape, f"{name}: shape {out.shape} vs {ref.shape}"
        out32 = out.astype(jnp.float32)
        err = float(jnp.max(jnp.abs(out32 - ref)))
        assert jnp.allclose(out32, ref, atol=atol, rtol=rtol), \
            f"{name}: mismatch, max abs err {err}"

    key = jax.random.PRNGKey(0)

    # Case 1: small shapes of the decorated Linear; prep once, apply twice
    # (demonstrates the hoisted/cached weight prep being reused across forwards).
    k1, k1b, key = jax.random.split(key, 3)
    x, W, b, A, B = make_inputs(k1, batch=2, seq=8, in_f=32, out_f=32, rank=4)
    alpha, rank = 8.0, 4
    params = prepare_lora_linear(W, b, A, B, alpha, rank)
    for step, xi in enumerate([x, jax.random.normal(k1b, x.shape, jnp.float32)]):
        out = jax.block_until_ready(lora_linear_apply(params, xi))
        x2d = xi.reshape(-1, 32)
        ref = (x2d @ W.T + b + (alpha / rank) * (x2d @ A) @ B).reshape(2, 8, 32)
        check(out, ref, 1e-4, 1e-4, f"case1_step{step}")

    # Case 2: larger M (training/prefill-like) with wider output.
    k2, key = jax.random.split(key)
    x, W, b, A, B = make_inputs(k2, batch=2, seq=160, in_f=128, out_f=384, rank=8)
    alpha, rank = 16.0, 8
    out = jax.block_until_ready(lora_decorator_forward(x, W, b, A, B, alpha, rank))
    x2d = x.reshape(-1, 128)
    ref = (x2d @ W.T + b + (alpha / rank) * (x2d @ A) @ B).reshape(2, 160, 384)
    check(out, ref, 5e-3, 5e-3, "case2")

    # Case 3: decode-like shape (single M tile, several N tiles) -> exercises the
    # N-parallel grid ordering with per-N-tile x@A recompute.
    k3, key = jax.random.split(key)
    x, W, b, A, B = make_inputs(k3, batch=1, seq=16, in_f=128, out_f=1024, rank=8)
    alpha, rank = 16.0, 8
    out = jax.block_until_ready(lora_decorator_forward(x, W, b, A, B, alpha, rank))
    x2d = x.reshape(-1, 128)
    ref = (x2d @ W.T + b + (alpha / rank) * (x2d @ A) @ B).reshape(1, 16, 1024)
    check(out, ref, 5e-3, 5e-3, "case3")

    # Case 4: bf16 compute path (weights/activations bf16, f32 accumulate + epilogue).
    k4, key = jax.random.split(key)
    x, W, b, A, B = make_inputs(k4, batch=2, seq=32, in_f=64, out_f=192, rank=4)
    alpha, rank = 8.0, 4
    out = jax.block_until_ready(
        lora_decorator_forward(x, W, b, A, B, alpha, rank, compute_dtype=jnp.bfloat16))
    xc = x.reshape(-1, 64).astype(jnp.bfloat16).astype(jnp.float32)
    Wc = W.astype(jnp.bfloat16).astype(jnp.float32)
    Ac = A.astype(jnp.bfloat16).astype(jnp.float32)
    Bc = (B * (alpha / rank)).astype(jnp.bfloat16).astype(jnp.float32)
    xa = (xc @ Ac).astype(jnp.bfloat16).astype(jnp.float32)
    ref = (xc @ Wc.T + b + xa @ Bc).reshape(2, 32, 192)
    check(out, ref, 2e-2, 2e-2, "case4_bf16")

    print("KERNEL_OK")
</pallas_src>

<mosaic_0001>
module attributes {stable_mosaic.version = 11 : i64} {
  func.func @kernel(%arg0: i32, %arg1: i32, %arg2: i32, %arg3: memref<16x32xf32, #tpu.memory_space<vmem>>, %arg4: memref<32x128xf32, #tpu.memory_space<vmem>>, %arg5: memref<1x128xf32, #tpu.memory_space<vmem>>, %arg6: memref<32x128xf32, #tpu.memory_space<vmem>>, %arg7: memref<128x128xf32, #tpu.memory_space<vmem>>, %arg8: memref<16x128xf32, #tpu.memory_space<vmem>>, %arg9: memref<16x128xf32, #tpu.memory_space<vmem>>) attributes {dimension_semantics = [#tpu.dimension_semantics<parallel>, #tpu.dimension_semantics<arbitrary>, #tpu.dimension_semantics<arbitrary>], iteration_bounds = array<i64: 1, 1, 1>, scalar_prefetch = 0 : i64, scratch_operands = 1 : i64, tpu.core_type = #tpu.core_type<tc>, window_params = [{transform_indices = @transform_0, window_bounds = array<i64: 16, 32>}, {transform_indices = @transform_1, window_bounds = array<i64: 32, 128>}, {transform_indices = @transform_2, window_bounds = array<i64: 1, 128>}, {pipeline_mode = #tpu.pipeline_mode<synchronous>, transform_indices = @transform_3, window_bounds = array<i64: 32, 128>}, {transform_indices = @transform_4, window_bounds = array<i64: 128, 128>}, {transform_indices = @transform_5, window_bounds = array<i64: 16, 128>}]} {
    %c0_i32 = arith.constant 0 : i32
    %0 = arith.cmpi eq, %arg1, %c0_i32 : i32
    %1 = arith.extui %0 : i1 to i32
    %c0_i32_0 = arith.constant 0 : i32
    %2 = arith.cmpi ne, %1, %c0_i32_0 : i32
    scf.if %2 {
      %c0_13 = arith.constant 0 : index
      %c0_14 = arith.constant 0 : index
      %14 = vector.load %arg3[%c0_13, %c0_14] : memref<16x32xf32, #tpu.memory_space<vmem>>, vector<16x32xf32>
      %c0_15 = arith.constant 0 : index
      %c0_16 = arith.constant 0 : index
      %15 = vector.load %arg6[%c0_15, %c0_16] : memref<32x128xf32, #tpu.memory_space<vmem>>, vector<32x128xf32>
      %cst_17 = arith.constant dense<0.000000e+00> : vector<16x128xf32>
      %16 = tpu.matmul %14, %15, %cst_17 {dimension_numbers = #tpu.dot_dimension_numbers<[1], [0], [0], [1], [0, 0, 1, 1], [], []>} : vector<16x32xf32>, vector<32x128xf32>, vector<16x128xf32> -> vector<16x128xf32>
      %c0_18 = arith.constant 0 : index
      %c0_19 = arith.constant 0 : index
      %17 = vector.load %arg9[%c0_18, %c0_19] : memref<16x128xf32, #tpu.memory_space<vmem>>, vector<16x128xf32>
      tpu.vector_store %arg9[%c0_18, %c0_19], %16 {strides = array<i32>} : memref<16x128xf32, #tpu.memory_space<vmem>>, vector<16x128xf32>,
    } else {
    }
    %c0 = arith.constant 0 : index
    %c0_1 = arith.constant 0 : index
    %3 = vector.load %arg3[%c0, %c0_1] : memref<16x32xf32, #tpu.memory_space<vmem>>, vector<16x32xf32>
    %c0_2 = arith.constant 0 : index
    %c0_3 = arith.constant 0 : index
    %4 = vector.load %arg4[%c0_2, %c0_3] : memref<32x128xf32, #tpu.memory_space<vmem>>, vector<32x128xf32>
    %cst = arith.constant dense<0.000000e+00> : vector<16x128xf32>
    %5 = tpu.matmul %3, %4, %cst {dimension_numbers = #tpu.dot_dimension_numbers<[1], [0], [0], [1], [0, 0, 1, 1], [], []>} : vector<16x32xf32>, vector<32x128xf32>, vector<16x128xf32> -> vector<16x128xf32>
    %c0_4 = arith.constant 0 : index
    %c0_5 = arith.constant 0 : index
    %6 = vector.load %arg9[%c0_4, %c0_5] : memref<16x128xf32, #tpu.memory_space<vmem>>, vector<16x128xf32>
    %c0_6 = arith.constant 0 : index
    %c0_7 = arith.constant 0 : index
    %7 = vector.load %arg7[%c0_6, %c0_7] : memref<128x128xf32, #tpu.memory_space<vmem>>, vector<128x128xf32>
    %cst_8 = arith.constant dense<0.000000e+00> : vector<16x128xf32>
    %8 = tpu.matmul %6, %7, %cst_8 {dimension_numbers = #tpu.dot_dimension_numbers<[1], [0], [0], [1], [0, 0, 1, 1], [], []>} : vector<16x128xf32>, vector<128x128xf32>, vector<16x128xf32> -> vector<16x128xf32>
    %9 = arith.addf %5, %8 : vector<16x128xf32>
    %c0_9 = arith.constant 0 : index
    %c0_10 = arith.constant 0 : index
    %10 = vector.load %arg5[%c0_9, %c0_10] : memref<1x128xf32, #tpu.memory_space<vmem>>, vector<1x128xf32>
    %11 = vector.broadcast %10 : vector<1x128xf32> to vector<16x128xf32>
    %12 = arith.addf %9, %11 : vector<16x128xf32>
    %c0_11 = arith.constant 0 : index
    %c0_12 = arith.constant 0 : index
    %13 = vector.load %arg8[%c0_11, %c0_12] : memref<16x128xf32, #tpu.memory_space<vmem>>, vector<16x128xf32>
    tpu.vector_store %arg8[%c0_11, %c0_12], %12 {strides = array<i32>} : memref<16x128xf32, #tpu.memory_space<vmem>>, vector<16x128xf32>,
    return
  }
  func.func @transform_0(%arg0: i32, %arg1: i32, %arg2: i32) -> (i32, i32) {
    %c0_i32 = arith.constant 0 : i32
    return %arg0, %arg2 : i32, i32
  }
  func.func @transform_1(%arg0: i32, %arg1: i32, %arg2: i32) -> (i32, i32) {
    %c0_i32 = arith.constant 0 : i32
    return %arg2, %arg1 : i32, i32
  }
  func.func @transform_2(%arg0: i32, %arg1: i32, %arg2: i32) -> (i32, i32) {
    %c0_i32 = arith.constant 0 : i32
    %c0_i32_0 = arith.constant 0 : i32
    return %c0_i32, %arg1 : i32, i32
  }
  func.func @transform_3(%arg0: i32, %arg1: i32, %arg2: i32) -> (i32, i32) {
    %c0_i32 = arith.constant 0 : i32
    %c0_i32_0 = arith.constant 0 : i32
    return %arg2, %c0_i32 : i32, i32
  }
  func.func @transform_4(%arg0: i32, %arg1: i32, %arg2: i32) -> (i32, i32) {
    %c0_i32 = arith.constant 0 : i32
    %c0_i32_0 = arith.constant 0 : i32
    return %c0_i32, %arg1 : i32, i32
  }
  func.func @transform_5(%arg0: i32, %arg1: i32, %arg2: i32) -> (i32, i32) {
    %c0_i32 = arith.constant 0 : i32
    return %arg0, %arg1 : i32, i32
  }
}

module attributes {stable_mosaic.version = 11 : i64} {
  func.func @kernel(%arg0: i32, %arg1: i32, %arg2: i32, %arg3: memref<16x32xf32, #tpu.memory_space<vmem>>, %arg4: memref<32x128xf32, #tpu.memory_space<vmem>>, %arg5: memref<1x128xf32, #tpu.memory_space<vmem>>, %arg6: memref<32x128xf32, #tpu.memory_space<vmem>>, %arg7: memref<128x128xf32, #tpu.memory_space<vmem>>, %arg8: memref<16x128xf32, #tpu.memory_space<vmem>>, %arg9: memref<16x128xf32, #tpu.memory_space<vmem>>) attributes {dimension_semantics = [#tpu.dimension_semantics<parallel>, #tpu.dimension_semantics<arbitrary>, #tpu.dimension_semantics<arbitrary>], iteration_bounds = array<i64: 1, 1, 1>, scalar_prefetch = 0 : i64, scratch_operands = 1 : i64, tpu.core_type = #tpu.core_type<tc>, window_params = [{transform_indices = @transform_0, window_bounds = array<i64: 16, 32>}, {transform_indices = @transform_1, window_bounds = array<i64: 32, 128>}, {transform_indices = @transform_2, window_bounds = array<i64: 1, 128>}, {transform_indices = @transform_3, window_bounds = array<i64: 32, 128>}, {transform_indices = @transform_4, window_bounds = array<i64: 128, 128>}, {transform_indices = @transform_5, window_bounds = array<i64: 16, 128>}]} {
    %c0_i32 = arith.constant 0 : i32
    %0 = arith.cmpi eq, %arg1, %c0_i32 : i32
    %1 = arith.extui %0 : i1 to i32
    %c0_i32_0 = arith.constant 0 : i32
    %2 = arith.cmpi ne, %1, %c0_i32_0 : i32
    scf.if %2 {
      %c0_13 = arith.constant 0 : index
      %c0_14 = arith.constant 0 : index
      %14 = vector.load %arg3[%c0_13, %c0_14] : memref<16x32xf32, #tpu.memory_space<vmem>>, vector<16x32xf32>
      %c0_15 = arith.constant 0 : index
      %c0_16 = arith.constant 0 : index
      %15 = vector.load %arg6[%c0_15, %c0_16] : memref<32x128xf32, #tpu.memory_space<vmem>>, vector<32x128xf32>
      %cst_17 = arith.constant dense<0.000000e+00> : vector<16x128xf32>
      %16 = tpu.matmul %14, %15, %cst_17 {dimension_numbers = #tpu.dot_dimension_numbers<[1], [0], [0], [1], [0, 0, 1, 1], [], []>} : vector<16x32xf32>, vector<32x128xf32>, vector<16x128xf32> -> vector<16x128xf32>
      %c0_18 = arith.constant 0 : index
      %c0_19 = arith.constant 0 : index
      %17 = vector.load %arg9[%c0_18, %c0_19] : memref<16x128xf32, #tpu.memory_space<vmem>>, vector<16x128xf32>
      tpu.vector_store %arg9[%c0_18, %c0_19], %16 {strides = array<i32>} : memref<16x128xf32, #tpu.memory_space<vmem>>, vector<16x128xf32>,
    } else {
    }
    %c0 = arith.constant 0 : index
    %c0_1 = arith.constant 0 : index
    %3 = vector.load %arg3[%c0, %c0_1] : memref<16x32xf32, #tpu.memory_space<vmem>>, vector<16x32xf32>
    %c0_2 = arith.constant 0 : index
    %c0_3 = arith.constant 0 : index
    %4 = vector.load %arg4[%c0_2, %c0_3] : memref<32x128xf32, #tpu.memory_space<vmem>>, vector<32x128xf32>
    %cst = arith.constant dense<0.000000e+00> : vector<16x128xf32>
    %5 = tpu.matmul %3, %4, %cst {dimension_numbers = #tpu.dot_dimension_numbers<[1], [0], [0], [1], [0, 0, 1, 1], [], []>} : vector<16x32xf32>, vector<32x128xf32>, vector<16x128xf32> -> vector<16x128xf32>
    %c0_4 = arith.constant 0 : index
    %c0_5 = arith.constant 0 : index
    %6 = vector.load %arg9[%c0_4, %c0_5] : memref<16x128xf32, #tpu.memory_space<vmem>>, vector<16x128xf32>
    %c0_6 = arith.constant 0 : index
    %c0_7 = arith.constant 0 : index
    %7 = vector.load %arg7[%c0_6, %c0_7] : memref<128x128xf32, #tpu.memory_space<vmem>>, vector<128x128xf32>
    %cst_8 = arith.constant dense<0.000000e+00> : vector<16x128xf32>
    %8 = tpu.matmul %6, %7, %cst_8 {dimension_numbers = #tpu.dot_dimension_numbers<[1], [0], [0], [1], [0, 0, 1, 1], [], []>} : vector<16x128xf32>, vector<128x128xf32>, vector<16x128xf32> -> vector<16x128xf32>
    %9 = arith.addf %5, %8 : vector<16x128xf32>
    %c0_9 = arith.constant 0 : index
    %c0_10 = arith.constant 0 : index
    %10 = vector.load %arg5[%c0_9, %c0_10] : memref<1x128xf32, #tpu.memory_space<vmem>>, vector<1x128xf32>
    %11 = vector.broadcast %10 : vector<1x128xf32> to vector<16x128xf32>
    %12 = arith.addf %9, %11 : vector<16x128xf32>
    %c0_11 = arith.constant 0 : index
    %c0_12 = arith.constant 0 : index
    %13 = vector.load %arg8[%c0_11, %c0_12] : memref<16x128xf32, #tpu.memory_space<vmem>>, vector<16x128xf32>
    tpu.vector_store %arg8[%c0_11, %c0_12], %12 {strides = array<i32>} : memref<16x128xf32, #tpu.memory_space<vmem>>, vector<16x128xf32>,
    return
  }
  func.func @transform_0(%arg0: i32, %arg1: i32, %arg2: i32) -> (i32, i32) {
    %c0_i32 = arith.constant 0 : i32
    return %arg0, %arg2 : i32, i32
  }
  func.func @transform_1(%arg0: i32, %arg1: i32, %arg2: i32) -> (i32, i32) {
    %c0_i32 = arith.constant 0 : i32
    return %arg2, %arg1 : i32, i32
  }
  func.func @transform_2(%arg0: i32, %arg1: i32, %arg2: i32) -> (i32, i32) {
    %c0_i32 = arith.constant 0 : i32
    %c0_i32_0 = arith.constant 0 : i32
    return %c0_i32, %arg1 : i32, i32
  }
  func.func @transform_3(%arg0: i32, %arg1: i32, %arg2: i32) -> (i32, i32) {
    %c0_i32 = arith.constant 0 : i32
    %c0_i32_0 = arith.constant 0 : i32
    return %arg2, %c0_i32 : i32, i32
  }
  func.func @transform_4(%arg0: i32, %arg1: i32, %arg2: i32) -> (i32, i32) {
    %c0_i32 = arith.constant 0 : i32
    %c0_i32_0 = arith.constant 0 : i32
    return %c0_i32, %arg1 : i32, i32
  }
  func.func @transform_5(%arg0: i32, %arg1: i32, %arg2: i32) -> (i32, i32) {
    %c0_i32 = arith.constant 0 : i32
    return %arg0, %arg1 : i32, i32
  }
}

</mosaic_0001>

<bundles_post_ra>
// kernel: tpu_custom_call.1
= control target key start
LH: loop header
LB: loop body
LE: loop exit
PB: predicated region body
PF: predicated region fallthrough
CT: control target
= control target key end

     0   :  { %10 = vsyncpa [#allocation4], 0  ;;  %s662_s0 = inlined_call_operand.hbm [shape: f32[16,32], index: 0, kind: input, shape index: {}]   ;;  %s663_s1 = inlined_call_operand.hbm [shape: f32[32,128], index: 1, kind: input, shape index: {}]   ;;  %s664_s2 = inlined_call_operand.vmem [shape: f32[1,128], index: 2, kind: input, shape index: {}]   ;;  %s665_s3 = inlined_call_operand.hbm [shape: f32[32,128], index: 3, kind: input, shape index: {}]   ;;  %s666_s4 = inlined_call_operand.hbm [shape: f32[128,128], index: 4, kind: input, shape index: {}]   ;;  %s667_s5 = inlined_call_operand.hbm [shape: f32[16,128], index: 5, kind: output, shape index: {}]  }
   0x1   :  { %11 = vsyncpa [#allocation7], 0 }
   0x2   :  { %12 = vsyncpa [#allocation10], 0 }
   0x3   :  { %13 = vsyncpa [#allocation5], 0  ;;  %s588_s18 = smov [#allocation6]   ;;  %s589_s20 = smov [#allocation3]  }
   0x4   :  { %s31_s19 = sshll.u32 %s588_s18, 4  ;;  %s19_s21 = sshll.u32 %s589_s20, 4  ;;  %s32_s19 = int_to_ptr.vmem [resolvable:$true] %s31_s19  ;;  %s20_s21 = int_to_ptr.vmem [resolvable:$true] %s19_s21 }
   0x5   :  { %s488_s22 = scalar_lea.vmem %s32_s19, 512  ;;  %p493_p1 = scmp.lt.s32.totalorder %s32_s19, %s32_s19 }
   0x6   :  { %p489_p0 = scmp.ne.s32.totalorder %s32_s19, %s488_s22  ;;  %p494_p2 = scmp.lt.s32.totalorder %s488_s22, %s488_s22 }
   0x8   :  { %p495_p3 = por %p494_p2, %p493_p1 }
   0xa   :  { %p496_p4 = pnand %p495_p3, %p489_p0 }
   0xc   :  { %499 = shalt.err (!%p496_p4)
}
   0xd   :  { %s590_s23 = smov 128   ;;  %s591_s24 = smov 8  }
   0xe   :  { %37 = dma.hbm_to_vmem [thread:$0]  %s663_s1, 512, %s32_s19, [#allocation7], %s590_s23, %s590_s23, %s591_s24  }
   0xf   :  { %s508_s27 = scalar_lea.vmem %s20_s21, 256  ;;  %p513_p6 = scmp.lt.s32.totalorder %s20_s21, %s20_s21 }
  0x10   :  { %p509_p5 = scmp.ne.s32.totalorder %s20_s21, %s508_s27  ;;  %p514_p7 = scmp.lt.s32.totalorder %s508_s27, %s508_s27 }
  0x12   :  { %p515_p8 = por %p514_p7, %p513_p6 }
  0x14   :  { %p516_p9 = pnand %p515_p8, %p509_p5 }
  0x16   :  { %519 = shalt.err (!%p516_p9)
}
  0x17   :  { %25 = dma.hbm_to_vmem [thread:$0]  %s662_s0, 256, %s20_s21, [#allocation4], %s590_s23, %s590_s23, %s591_s24  }
  0x18   :  { %s592_s30 = smov [#allocation8]   ;;  %s593_s7 = smov [#allocation9]  }
  0x19   :  { %s45_s6 = sshll.u32 %s592_s30, 4  ;;  %s57_s8 = sshll.u32 %s593_s7, 4  ;;  %s46_s6 = int_to_ptr.vmem [resolvable:$true] %s45_s6  ;;  %s58_s8 = int_to_ptr.vmem [resolvable:$true] %s57_s8 }
  0x1a   :  { %s528_s1 = scalar_lea.vmem %s46_s6, 512  ;;  %p533_p11 = scmp.lt.s32.totalorder %s46_s6, %s46_s6 }
  0x1b   :  { %p529_p10 = scmp.ne.s32.totalorder %s46_s6, %s528_s1  ;;  %p534_p12 = scmp.lt.s32.totalorder %s528_s1, %s528_s1 }
  0x1d   :  { %p535_p13 = por %p534_p12, %p533_p11 }
  0x1f   :  { %p536_p0 = pnand %p535_p13, %p529_p10 }
  0x21   :  { %539 = shalt.err (!%p536_p0)
}
  0x22   :  { %51 = dma.hbm_to_vmem [thread:$0]  %s665_s3, 512, %s46_s6, [#allocation7], %s590_s23, %s590_s23, %s591_s24  }
  0x23   :  { %s548_s0 = scalar_lea.vmem %s58_s8, 2048  ;;  %p553_p2 = scmp.lt.s32.totalorder %s58_s8, %s58_s8 }
  0x24   :  { %p549_p1 = scmp.ne.s32.totalorder %s58_s8, %s548_s0  ;;  %p554_p3 = scmp.lt.s32.totalorder %s548_s0, %s548_s0 }
  0x26   :  { %p555_p4 = por %p554_p3, %p553_p2 }
  0x28   :  { %p556_p5 = pnand %p555_p4, %p549_p1 }
  0x2a   :  { %559 = shalt.err (!%p556_p5)
}
  0x2b   :  { %63 = dma.hbm_to_vmem [thread:$0]  %s666_s4, 2048, %s58_s8, [#allocation10], %s590_s23, %s590_s23, %s591_s24  }
  0x2c   :  { %580 = dma.done.wait [#allocation4], 256  }
  0x2d   :  { %581 = vsyncadd [#allocation4], 4294967040 }
  0x2e   :  { %582 = dma.done.wait [#allocation7], 1024  }
  0x2f   :  { %583 = vsyncadd [#allocation7], 4294966272 }
  0x30   :  { %584 = dma.done.wait [#allocation10], 2048  }
  0x31   :  { %585 = vsyncadd [#allocation10], 4294965248  ;;  %vm86_vm0 = vcmask 261120   ;;  %v85_v0 = vld [vmem:[#allocation8 + $0x18] sm:$0xff]  ;;  %v84_v1 = vld [vmem:[#allocation8 + $0x10] sm:$0xff]  ;;  %s594_s13 = smov [#allocation11]  }
  0x32   :  { %416 = vmatprep.subr.mxu0 %v85_v0  ;;  %v80_v2 = vld [vmem:[#allocation3] sm:$0xff]  ;;  %v83_v3 = vld [vmem:[#allocation8 + $0x8] sm:$0xff]  ;;  %v193_v4 = vld [vmem:[#allocation9 + $0x78] sm:$0xff]  ;;  %s367_s14 = sshll.u32 %s594_s13, 4  ;;  %s368_s14 = int_to_ptr.vmem [resolvable:$true] %s367_s14 }
  0x33   :  { %417 = vmatpush3.msra.mxu0 %v85_v0  ;;  %424 = vmatprep.mubr.msk.f32.mxu0 %vm86_vm0, %v80_v2  ;;  %v192_v5 = vld [vmem:[#allocation9 + $0x70] sm:$0xff]  ;;  %v82_v6 = vld [vmem:[#allocation8] sm:$0xff]  ;;  %v191_v7 = vld [vmem:[#allocation9 + $0x68] sm:$0xff]  ;;  %s560_s15 = scalar_lea.vmem %s368_s14, 256  ;;  %p565_p7 = scmp.lt.s32.totalorder %s368_s14, %s368_s14 }
  0x34   :  { %418 = vmatprep.subr.mxu0 %v84_v1  ;;  %427 = vmatprep.subr.mxu1 %v193_v4  ;;  %v81_v8 = vld [vmem:[#allocation3 + $0x8] sm:$0xff]  ;;  %v190_v9 = vld [vmem:[#allocation9 + $0x60] sm:$0xff]  ;;  %v174_v12 = vld [vmem:[#allocation6 + $0x10] sm:$0xff]  ;;  %p561_p6 = scmp.ne.s32.totalorder %s368_s14, %s560_s15  ;;  %p566_p8 = scmp.lt.s32.totalorder %s560_s15, %s560_s15 }
  0x35   :  { %419 = vmatpush3.msra.mxu0 %v84_v1  ;;  %428 = vmatpush3.msra.mxu1 %v193_v4  ;;  %v175_v10 = vld [vmem:[#allocation6 + $0x18] sm:$0xff]  ;;  %v188_v13 = vld [vmem:[#allocation9 + $0x50] sm:$0xff]  ;;  %v173_v14 = vld [vmem:[#allocation6 + $0x8] sm:$0xff] }
  0x36   :  { %420 = vmatprep.subr.mxu0 %v83_v3  ;;  %429 = vmatprep.subr.mxu1 %v192_v5  ;;  %v189_v11 = vld [vmem:[#allocation9 + $0x58] sm:$0xff]  ;;  %v187_v15 = vld [vmem:[#allocation9 + $0x48] sm:$0xff]  ;;  %v186_v16 = vld [vmem:[#allocation9 + $0x40] sm:$0xff]  ;;  %p567_p9 = por %p566_p8, %p565_p7 }
  0x37   :  { %421 = vmatpush3.msra.mxu0 %v83_v3  ;;  %430 = vmatpush3.msra.mxu1 %v192_v5  ;;  %v185_v17 = vld [vmem:[#allocation9 + $0x38] sm:$0xff]  ;;  %v184_v18 = vld [vmem:[#allocation9 + $0x30] sm:$0xff]  ;;  %v183_v19 = vld [vmem:[#allocation9 + $0x28] sm:$0xff] }
  0x38   :  { %422 = vmatprep.subr.mxu0 %v82_v6  ;;  %431 = vmatprep.subr.mxu1 %v191_v7  ;;  %v182_v20 = vld [vmem:[#allocation9 + $0x20] sm:$0xff]  ;;  %v181_v21 = vld [vmem:[#allocation9 + $0x18] sm:$0xff]  ;;  %v180_v22 = vld [vmem:[#allocation9 + $0x10] sm:$0xff]  ;;  %p568_p10 = pnand %p567_p9, %p561_p6 }
  0x39   :  { %423 = vmatpush3.msra.mxu0 %v82_v6  ;;  %432 = vmatpush3.msra.mxu1 %v191_v7  ;;  %v179_v23 = vld [vmem:[#allocation9 + $0x8] sm:$0xff]  ;;  %v172_v24 = vld [vmem:[#allocation6] sm:$0xff]  ;;  %v385_v30 = vld [vmem:[%s664_s2] ss:$0 sm:$0xff] }
  0x3a   :  { %425 = vmatmul.mubr.msk.f32.vlgmr.msra.gmra.mxu0 %vm86_vm0, %v81_v8  ;;  %433 = vmatprep.subr.mxu1 %v190_v9  ;;  %v178_v25 = vld [vmem:[#allocation9] sm:$0xff] }
  0x3b   :  { %434 = vmatpush3.msra.mxu1 %v190_v9  ;;  %462 = vmatprep.subr.mxu0 %v175_v10 }
  0x3c   :  { %435 = vmatprep.subr.mxu1 %v189_v11  ;;  %463 = vmatpush3.msra.mxu0 %v175_v10 }
  0x3d   :  { %436 = vmatpush3.msra.mxu1 %v189_v11  ;;  %464 = vmatprep.subr.mxu0 %v174_v12 }
  0x3e   :  { %437 = vmatprep.subr.mxu1 %v188_v13  ;;  %465 = vmatpush3.msra.mxu0 %v174_v12 }
  0x3f   :  { %438 = vmatpush3.msra.mxu1 %v188_v13  ;;  %466 = vmatprep.subr.mxu0 %v173_v14 }
  0x40   :  { %439 = vmatprep.subr.mxu1 %v187_v15  ;;  %467 = vmatpush3.msra.mxu0 %v173_v14 }
  0x41   :  { %440 = vmatpush3.msra.mxu1 %v187_v15  ;;  %470 = vmatprep.mubr.msk.f32.mxu0 %vm86_vm0, %v80_v2 }
  0x42   :  { %441 = vmatprep.subr.mxu1 %v186_v16  ;;  %468 = vmatprep.subr.mxu0 %v172_v24 }
  0x43   :  { %442 = vmatpush3.msra.mxu1 %v186_v16  ;;  %469 = vmatpush3.msra.mxu0 %v172_v24 }
  0x44   :  { %443 = vmatprep.subr.mxu1 %v185_v17  ;;  %471 = vmatmul.mubr.msk.f32.vlgmr.msra.gmra.mxu0 %vm86_vm0, %v81_v8 }
  0x45   :  { %444 = vmatpush3.msra.mxu1 %v185_v17 }
  0x46   :  { %445 = vmatprep.subr.mxu1 %v184_v18 }
  0x47   :  { %446 = vmatpush3.msra.mxu1 %v184_v18 }
  0x48   :  { %447 = vmatprep.subr.mxu1 %v183_v19 }
  0x49   :  { %448 = vmatpush3.msra.mxu1 %v183_v19 }
  0x4a   :  { %449 = vmatprep.subr.mxu1 %v182_v20 }
  0x4b   :  { %450 = vmatpush3.msra.mxu1 %v182_v20 }
  0x4c   :  { %451 = vmatprep.subr.mxu1 %v181_v21 }
  0x4d   :  { %452 = vmatpush3.msra.mxu1 %v181_v21 }
  0x4e   :  { %453 = vmatprep.subr.mxu1 %v180_v22 }
  0x4f   :  { %454 = vmatpush3.msra.mxu1 %v180_v22 }
  0x50   :  { %455 = vmatprep.subr.mxu1 %v179_v23 }
  0x51   :  { %456 = vmatpush3.msra.mxu1 %v179_v23 }
  0x52   :  { %457 = vmatprep.subr.mxu1 %v178_v25 }
  0x53   :  { %458 = vmatpush3.msra.mxu1 %v178_v25 }
  0xfa   :  { %v426_v26 = vpop.f32.mrf.mxu0 }
  0xfc   :  { %v159_v27 = vpop.f32.mrf.mxu0 }
  0xfd   :  { %459 = vmatprep.mubr.f32.mxu1 %v159_v27 }
  0xfe   :  { %460 = vmatmul.mubr.f32.vlgmr.msra.gmra.mxu1 %v426_v26 }
 0x104   :  { %v472_v28 = vpop.f32.mrf.mxu0 }
 0x106   :  { %v342_v32 = vpop.f32.mrf.mxu0 }
 0x1be   :  { %v461_v29 = vpop.f32.mrf.mxu1 }
 0x1bf   :  { %v348_v31 = vadd.f32 %v472_v28, %v461_v29 }
 0x1c0   :  { %v260_v33 = vpop.f32.mrf.mxu1 }
 0x1c1   :  { %v359_v34 = vadd.f32 %v385_v30, %v348_v31  ;;  %v343_v35 = vadd.f32 %v342_v32, %v260_v33 }
 0x1c3   :  { %361 = vst [vmem:[#allocation11 + $0x8] sm:$0xff] %v359_v34  ;;  %v358_v36 = vadd.f32 %v385_v30, %v343_v35 }
 0x1c5   :  { %360 = vst [vmem:[#allocation11] sm:$0xff] %v358_v36 }
 0x1c6   :  { %571 = shalt.err (!%p568_p10)
}
 0x1c7   :  { %373 = dma.vmem_to_hbm [thread:$0]  %s368_s14, 256, %s667_s5, [#allocation5], %s590_s23, %s590_s23, %s591_s24  }
 0x1c8   :  { %586 = dma.done.wait [#allocation5], 256  }
 0x1c9   :  { %587 = vsyncadd [#allocation5], 4294967040 }
 0x1ca   :  { %377 = vsyncpa [#allocation4], 1 }
 0x1cb   :  { %378 = vsyncpa [#allocation7], 1 }
 0x1cc   :  { %379 = vsyncpa [#allocation10], 1 }
 0x1cd   :  { %380 = vsyncpa [#allocation5], 1 }

// kernel: tpu_custom_call.1
= control target key start
LH: loop header
LB: loop body
LE: loop exit
PB: predicated region body
PF: predicated region fallthrough
CT: control target
= control target key end

     0   :  { %10 = vsyncpa [#allocation4], 0  ;;  %s662_s0 = inlined_call_operand.hbm [shape: f32[16,32], index: 0, kind: input, shape index: {}]   ;;  %s663_s1 = inlined_call_operand.hbm [shape: f32[32,128], index: 1, kind: input, shape index: {}]   ;;  %s664_s2 = inlined_call_operand.vmem [shape: f32[1,128], index: 2, kind: input, shape index: {}]   ;;  %s665_s3 = inlined_call_operand.hbm [shape: f32[32,128], index: 3, kind: input, shape index: {}]   ;;  %s666_s4 = inlined_call_operand.hbm [shape: f32[128,128], index: 4, kind: input, shape index: {}]   ;;  %s667_s5 = inlined_call_operand.hbm [shape: f32[16,128], index: 5, kind: output, shape index: {}]  }
   0x1   :  { %11 = vsyncpa [#allocation7], 0 }
   0x2   :  { %12 = vsyncpa [#allocation10], 0 }
   0x3   :  { %13 = vsyncpa [#allocation5], 0  ;;  %s588_s18 = smov [#allocation6]   ;;  %s589_s20 = smov [#allocation3]  }
   0x4   :  { %s31_s19 = sshll.u32 %s588_s18, 4  ;;  %s19_s21 = sshll.u32 %s589_s20, 4  ;;  %s32_s19 = int_to_ptr.vmem [resolvable:$true] %s31_s19  ;;  %s20_s21 = int_to_ptr.vmem [resolvable:$true] %s19_s21 }
   0x5   :  { %s488_s22 = scalar_lea.vmem %s32_s19, 512  ;;  %p493_p1 = scmp.lt.s32.totalorder %s32_s19, %s32_s19 }
   0x6   :  { %p489_p0 = scmp.ne.s32.totalorder %s32_s19, %s488_s22  ;;  %p494_p2 = scmp.lt.s32.totalorder %s488_s22, %s488_s22 }
   0x8   :  { %p495_p3 = por %p494_p2, %p493_p1 }
   0xa   :  { %p496_p4 = pnand %p495_p3, %p489_p0 }
   0xc   :  { %499 = shalt.err (!%p496_p4)
}
   0xd   :  { %s590_s23 = smov 128   ;;  %s591_s24 = smov 8  }
   0xe   :  { %37 = dma.hbm_to_vmem [thread:$0]  %s663_s1, 512, %s32_s19, [#allocation7], %s590_s23, %s590_s23, %s591_s24  }
   0xf   :  { %s508_s27 = scalar_lea.vmem %s20_s21, 256  ;;  %p513_p6 = scmp.lt.s32.totalorder %s20_s21, %s20_s21 }
  0x10   :  { %p509_p5 = scmp.ne.s32.totalorder %s20_s21, %s508_s27  ;;  %p514_p7 = scmp.lt.s32.totalorder %s508_s27, %s508_s27 }
  0x12   :  { %p515_p8 = por %p514_p7, %p513_p6 }
  0x14   :  { %p516_p9 = pnand %p515_p8, %p509_p5 }
  0x16   :  { %519 = shalt.err (!%p516_p9)
}
  0x17   :  { %25 = dma.hbm_to_vmem [thread:$0]  %s662_s0, 256, %s20_s21, [#allocation4], %s590_s23, %s590_s23, %s591_s24  }
  0x18   :  { %s592_s30 = smov [#allocation8]   ;;  %s593_s7 = smov [#allocation9]  }
  0x19   :  { %s45_s6 = sshll.u32 %s592_s30, 4  ;;  %s57_s8 = sshll.u32 %s593_s7, 4  ;;  %s46_s6 = int_to_ptr.vmem [resolvable:$true] %s45_s6  ;;  %s58_s8 = int_to_ptr.vmem [resolvable:$true] %s57_s8 }
  0x1a   :  { %s528_s1 = scalar_lea.vmem %s46_s6, 512  ;;  %p533_p11 = scmp.lt.s32.totalorder %s46_s6, %s46_s6 }
  0x1b   :  { %p529_p10 = scmp.ne.s32.totalorder %s46_s6, %s528_s1  ;;  %p534_p12 = scmp.lt.s32.totalorder %s528_s1, %s528_s1 }
  0x1d   :  { %p535_p13 = por %p534_p12, %p533_p11 }
  0x1f   :  { %p536_p0 = pnand %p535_p13, %p529_p10 }
  0x21   :  { %539 = shalt.err (!%p536_p0)
}
  0x22   :  { %51 = dma.hbm_to_vmem [thread:$0]  %s665_s3, 512, %s46_s6, [#allocation7], %s590_s23, %s590_s23, %s591_s24  }
  0x23   :  { %s548_s0 = scalar_lea.vmem %s58_s8, 2048  ;;  %p553_p2 = scmp.lt.s32.totalorder %s58_s8, %s58_s8 }
  0x24   :  { %p549_p1 = scmp.ne.s32.totalorder %s58_s8, %s548_s0  ;;  %p554_p3 = scmp.lt.s32.totalorder %s548_s0, %s548_s0 }
  0x26   :  { %p555_p4 = por %p554_p3, %p553_p2 }
  0x28   :  { %p556_p5 = pnand %p555_p4, %p549_p1 }
  0x2a   :  { %559 = shalt.err (!%p556_p5)
}
  0x2b   :  { %63 = dma.hbm_to_vmem [thread:$0]  %s666_s4, 2048, %s58_s8, [#allocation10], %s590_s23, %s590_s23, %s591_s24  }
  0x2c   :  { %580 = dma.done.wait [#allocation4], 256  }
  0x2d   :  { %581 = vsyncadd [#allocation4], 4294967040 }
  0x2e   :  { %582 = dma.done.wait [#allocation7], 1024  }
  0x2f   :  { %583 = vsyncadd [#allocation7], 4294966272 }
  0x30   :  { %584 = dma.done.wait [#allocation10], 2048  }
  0x31   :  { %585 = vsyncadd [#allocation10], 4294965248  ;;  %vm86_vm0 = vcmask 261120   ;;  %v85_v0 = vld [vmem:[#allocation8 + $0x18] sm:$0xff]  ;;  %v84_v1 = vld [vmem:[#allocation8 + $0x10] sm:$0xff]  ;;  %s594_s13 = smov [#allocation11]  }
  0x32   :  { %416 = vmatprep.subr.mxu0 %v85_v0  ;;  %v80_v2 = vld [vmem:[#allocation3] sm:$0xff]  ;;  %v83_v3 = vld [vmem:[#allocation8 + $0x8] sm:$0xff]  ;;  %v193_v4 = vld [vmem:[#allocation9 + $0x78] sm:$0xff]  ;;  %s367_s14 = sshll.u32 %s594_s13, 4  ;;  %s368_s14 = int_to_ptr.vmem [resolvable:$true] %s367_s14 }
  0x33   :  { %417 = vmatpush3.msra.mxu0 %v85_v0  ;;  %424 = vmatprep.mubr.msk.f32.mxu0 %vm86_vm0, %v80_v2  ;;  %v192_v5 = vld [vmem:[#allocation9 + $0x70] sm:$0xff]  ;;  %v82_v6 = vld [vmem:[#allocation8] sm:$0xff]  ;;  %v191_v7 = vld [vmem:[#allocation9 + $0x68] sm:$0xff]  ;;  %s560_s15 = scalar_lea.vmem %s368_s14, 256  ;;  %p565_p7 = scmp.lt.s32.totalorder %s368_s14, %s368_s14 }
  0x34   :  { %418 = vmatprep.subr.mxu0 %v84_v1  ;;  %427 = vmatprep.subr.mxu1 %v193_v4  ;;  %v81_v8 = vld [vmem:[#allocation3 + $0x8] sm:$0xff]  ;;  %v190_v9 = vld [vmem:[#allocation9 + $0x60] sm:$0xff]  ;;  %v174_v12 = vld [vmem:[#allocation6 + $0x10] sm:$0xff]  ;;  %p561_p6 = scmp.ne.s32.totalorder %s368_s14, %s560_s15  ;;  %p566_p8 = scmp.lt.s32.totalorder %s560_s15, %s560_s15 }
  0x35   :  { %419 = vmatpush3.msra.mxu0 %v84_v1  ;;  %428 = vmatpush3.msra.mxu1 %v193_v4  ;;  %v175_v10 = vld [vmem:[#allocation6 + $0x18] sm:$0xff]  ;;  %v188_v13 = vld [vmem:[#allocation9 + $0x50] sm:$0xff]  ;;  %v173_v14 = vld [vmem:[#allocation6 + $0x8] sm:$0xff] }
  0x36   :  { %420 = vmatprep.subr.mxu0 %v83_v3  ;;  %429 = vmatprep.subr.mxu1 %v192_v5  ;;  %v189_v11 = vld [vmem:[#allocation9 + $0x58] sm:$0xff]  ;;  %v187_v15 = vld [vmem:[#allocation9 + $0x48] sm:$0xff]  ;;  %v186_v16 = vld [vmem:[#allocation9 + $0x40] sm:$0xff]  ;;  %p567_p9 = por %p566_p8, %p565_p7 }
  0x37   :  { %421 = vmatpush3.msra.mxu0 %v83_v3  ;;  %430 = vmatpush3.msra.mxu1 %v192_v5  ;;  %v185_v17 = vld [vmem:[#allocation9 + $0x38] sm:$0xff]  ;;  %v184_v18 = vld [vmem:[#allocation9 + $0x30] sm:$0xff]  ;;  %v183_v19 = vld [vmem:[#allocation9 + $0x28] sm:$0xff] }
  0x38   :  { %422 = vmatprep.subr.mxu0 %v82_v6  ;;  %431 = vmatprep.subr.mxu1 %v191_v7  ;;  %v182_v20 = vld [vmem:[#allocation9 + $0x20] sm:$0xff]  ;;  %v181_v21 = vld [vmem:[#allocation9 + $0x18] sm:$0xff]  ;;  %v180_v22 = vld [vmem:[#allocation9 + $0x10] sm:$0xff]  ;;  %p568_p10 = pnand %p567_p9, %p561_p6 }
  0x39   :  { %423 = vmatpush3.msra.mxu0 %v82_v6  ;;  %432 = vmatpush3.msra.mxu1 %v191_v7  ;;  %v179_v23 = vld [vmem:[#allocation9 + $0x8] sm:$0xff]  ;;  %v172_v24 = vld [vmem:[#allocation6] sm:$0xff]  ;;  %v385_v30 = vld [vmem:[%s664_s2] ss:$0 sm:$0xff] }
  0x3a   :  { %425 = vmatmul.mubr.msk.f32.vlgmr.msra.gmra.mxu0 %vm86_vm0, %v81_v8  ;;  %433 = vmatprep.subr.mxu1 %v190_v9  ;;  %v178_v25 = vld [vmem:[#allocation9] sm:$0xff] }
  0x3b   :  { %434 = vmatpush3.msra.mxu1 %v190_v9  ;;  %462 = vmatprep.subr.mxu0 %v175_v10 }
  0x3c   :  { %435 = vmatprep.subr.mxu1 %v189_v11  ;;  %463 = vmatpush3.msra.mxu0 %v175_v10 }
  0x3d   :  { %436 = vmatpush3.msra.mxu1 %v189_v11  ;;  %464 = vmatprep.subr.mxu0 %v174_v12 }
  0x3e   :  { %437 = vmatprep.subr.mxu1 %v188_v13  ;;  %465 = vmatpush3.msra.mxu0 %v174_v12 }
  0x3f   :  { %438 = vmatpush3.msra.mxu1 %v188_v13  ;;  %466 = vmatprep.subr.mxu0 %v173_v14 }
  0x40   :  { %439 = vmatprep.subr.mxu1 %v187_v15  ;;  %467 = vmatpush3.msra.mxu0 %v173_v14 }
  0x41   :  { %440 = vmatpush3.msra.mxu1 %v187_v15  ;;  %470 = vmatprep.mubr.msk.f32.mxu0 %vm86_vm0, %v80_v2 }
  0x42   :  { %441 = vmatprep.subr.mxu1 %v186_v16  ;;  %468 = vmatprep.subr.mxu0 %v172_v24 }
  0x43   :  { %442 = vmatpush3.msra.mxu1 %v186_v16  ;;  %469 = vmatpush3.msra.mxu0 %v172_v24 }
  0x44   :  { %443 = vmatprep.subr.mxu1 %v185_v17  ;;  %471 = vmatmul.mubr.msk.f32.vlgmr.msra.gmra.mxu0 %vm86_vm0, %v81_v8 }
  0x45   :  { %444 = vmatpush3.msra.mxu1 %v185_v17 }
  0x46   :  { %445 = vmatprep.subr.mxu1 %v184_v18 }
  0x47   :  { %446 = vmatpush3.msra.mxu1 %v184_v18 }
  0x48   :  { %447 = vmatprep.subr.mxu1 %v183_v19 }
  0x49   :  { %448 = vmatpush3.msra.mxu1 %v183_v19 }
  0x4a   :  { %449 = vmatprep.subr.mxu1 %v182_v20 }
  0x4b   :  { %450 = vmatpush3.msra.mxu1 %v182_v20 }
  0x4c   :  { %451 = vmatprep.subr.mxu1 %v181_v21 }
  0x4d   :  { %452 = vmatpush3.msra.mxu1 %v181_v21 }
  0x4e   :  { %453 = vmatprep.subr.mxu1 %v180_v22 }
  0x4f   :  { %454 = vmatpush3.msra.mxu1 %v180_v22 }
  0x50   :  { %455 = vmatprep.subr.mxu1 %v179_v23 }
  0x51   :  { %456 = vmatpush3.msra.mxu1 %v179_v23 }
  0x52   :  { %457 = vmatprep.subr.mxu1 %v178_v25 }
  0x53   :  { %458 = vmatpush3.msra.mxu1 %v178_v25 }
  0xfa   :  { %v426_v26 = vpop.f32.mrf.mxu0 }
  0xfc   :  { %v159_v27 = vpop.f32.mrf.mxu0 }
  0xfd   :  { %459 = vmatprep.mubr.f32.mxu1 %v159_v27 }
  0xfe   :  { %460 = vmatmul.mubr.f32.vlgmr.msra.gmra.mxu1 %v426_v26 }
 0x104   :  { %v472_v28 = vpop.f32.mrf.mxu0 }
 0x106   :  { %v342_v32 = vpop.f32.mrf.mxu0 }
 0x1be   :  { %v461_v29 = vpop.f32.mrf.mxu1 }
 0x1bf   :  { %v348_v31 = vadd.f32 %v472_v28, %v461_v29 }
 0x1c0   :  { %v260_v33 = vpop.f32.mrf.mxu1 }
 0x1c1   :  { %v359_v34 = vadd.f32 %v385_v30, %v348_v31  ;;  %v343_v35 = vadd.f32 %v342_v32, %v260_v33 }
 0x1c3   :  { %361 = vst [vmem:[#allocation11 + $0x8] sm:$0xff] %v359_v34  ;;  %v358_v36 = vadd.f32 %v385_v30, %v343_v35 }
 0x1c5   :  { %360 = vst [vmem:[#allocation11] sm:$0xff] %v358_v36 }
 0x1c6   :  { %571 = shalt.err (!%p568_p10)
}
 0x1c7   :  { %373 = dma.vmem_to_hbm [thread:$0]  %s368_s14, 256, %s667_s5, [#allocation5], %s590_s23, %s590_s23, %s591_s24  }
 0x1c8   :  { %586 = dma.done.wait [#allocation5], 256  }
 0x1c9   :  { %587 = vsyncadd [#allocation5], 4294967040 }
 0x1ca   :  { %377 = vsyncpa [#allocation4], 1 }
 0x1cb   :  { %378 = vsyncpa [#allocation7], 1 }
 0x1cc   :  { %379 = vsyncpa [#allocation10], 1 }
 0x1cd   :  { %380 = vsyncpa [#allocation5], 1 }

</bundles_post_ra>
